<compile_context>
chip_gen: v7x
topology: tpu7x:2x2x1
jax: 0.10.0
libtpu: 0.0.40
codegen_flags: <defaults>
</compile_context>

<pallas_src>
import math

import jax
import jax.numpy as jnp
from jax import lax
from jax.experimental import pallas as pl
from jax.experimental.pallas import tpu as pltpu


_ACTIVATIONS = {
    "none": lambda x: x,
    "relu": lambda x: jnp.maximum(x, 0.0),
    "elu": lambda x: jnp.where(x > 0.0, x, jnp.expm1(x)),
    "sigmoid": jax.nn.sigmoid,
    "tanh": jnp.tanh,
    "softplus": jax.nn.softplus,
}
# Activations whose elementwise math hits the EUP (transcendentals).
_EUP_ACTS = {"elu", "sigmoid", "tanh", "softplus"}

_LANE = 128


def _round_up(x: int, m: int) -> int:
    return ((x + m - 1) // m) * m


# ----------------------------------------------------------------------------
# Fused path: one pallas_call, layer loop unrolled inside the kernel.
# ----------------------------------------------------------------------------
def _make_fused_kernel(nb_hidden: int, activation: str, eps: float, act_dtype):
    act = _ACTIVATIONS[activation]
    n_layers = nb_hidden + 1

    def kernel(*refs):
        # refs = (x, w_0..w_{L-1}, aux_0..aux_{L-1}, out)
        x_ref = refs[0]
        w_refs = refs[1:1 + n_layers]
        aux_refs = refs[1 + n_layers:1 + 2 * n_layers]
        out_ref = refs[1 + 2 * n_layers]

        h = x_ref[...]                                    # already act_dtype (host cast)
        for li in range(nb_hidden):
            # Linear (hidden bias dropped: exactly cancelled by BN mean subtraction).
            y = jnp.dot(h, w_refs[li][...], preferred_element_type=jnp.float32)
            # Training-mode BatchNorm1d (biased stats over the real batch),
            # affine fused into a single scale/shift; all f32 row math.
            gb = aux_refs[li][...]                        # (2, Np): [gamma; beta]
            mean = jnp.mean(y, axis=0, keepdims=True)     # (1, Np)
            yc = y - mean
            var = jnp.mean(yc * yc, axis=0, keepdims=True)
            scale = gb[0:1, :] * lax.rsqrt(var + eps)     # (1, Np)
            h = act(yc * scale + gb[1:2, :]).astype(act_dtype)
        # Final Linear with bias, lane-dense store.
        y = jnp.dot(h, w_refs[nb_hidden][...], preferred_element_type=jnp.float32)
        out_ref[...] = (y + aux_refs[nb_hidden][0:1, :]).astype(out_ref.dtype)

    return kernel


def _mlp_forward_fused(x, hidden_params, final_params, activation, eps,
                       mm_dtype, kp, fused_bytes):
    nb_hidden = len(hidden_params)
    n_layers = nb_hidden + 1
    B, input_size = x.shape
    output_size = final_params[0].shape[0]
    w_bytes = mm_dtype.itemsize

    def pad_w(w, kin_p, nout_p):
        # Pre-transpose to (in, out); zero-pad rows (in) and cols (out).
        wt = w.T.astype(jnp.float32)
        wt = jnp.pad(wt, ((0, kin_p - wt.shape[0]), (0, nout_p - wt.shape[1])))
        return wt.astype(mm_dtype)          # host-side cast (halves weight DMA at bf16)

    def pad_row(v, n_p):
        return jnp.pad(v.astype(jnp.float32), (0, n_p - v.shape[0]))

    w_list, aux_list = [], []
    for i, (w, _b, g, beta) in enumerate(hidden_params):
        w_list.append(pad_w(w, kp[i], kp[i + 1]))
        aux_list.append(jnp.stack([pad_row(g, kp[i + 1]),
                                   pad_row(beta, kp[i + 1])], axis=0))
    w_last, b_last = final_params
    w_list.append(pad_w(w_last, kp[-2], kp[-1]))
    aux_list.append(jnp.stack([pad_row(b_last, kp[-1]),
                               jnp.zeros((kp[-1],), jnp.float32)], axis=0))

    x_pad = jnp.pad(x.astype(jnp.float32),
                    ((0, 0), (0, kp[0] - input_size))).astype(mm_dtype)

    flops = sum(2 * B * kp[i] * kp[i + 1] for i in range(n_layers))
    trans = sum(kp[i + 1] + (B * kp[i + 1] if activation in _EUP_ACTS else 0)
                for i in range(nb_hidden))
    bytes_accessed = (B * kp[0] * w_bytes
                      + sum(kp[i] * kp[i + 1] for i in range(n_layers)) * w_bytes
                      + sum(2 * kp[i + 1] for i in range(n_layers)) * 4
                      + B * kp[-1] * 4)
    cost = pl.CostEstimate(flops=flops, transcendentals=trans,
                           bytes_accessed=bytes_accessed)

    vmem_lim = min(int(fused_bytes * 1.4) + (2 << 20), 64 << 20)
    vmem_spec = pl.BlockSpec(memory_space=pltpu.MemorySpace.VMEM)

    out_pad = pl.pallas_call(
        _make_fused_kernel(nb_hidden, activation, eps, mm_dtype),
        out_shape=jax.ShapeDtypeStruct((B, kp[-1]), jnp.float32),
        in_specs=[vmem_spec] * (1 + 2 * n_layers),
        out_specs=vmem_spec,
        compiler_params=pltpu.CompilerParams(vmem_limit_bytes=vmem_lim),
        cost_estimate=cost,
    )(x_pad, *w_list, *aux_list)

    return out_pad[:, :output_size]


# ----------------------------------------------------------------------------
# Gridded fallback: one grid step per layer, persistent VMEM activation,
# double-buffered weight blocks (used when the fused footprint is too big).
# ----------------------------------------------------------------------------
def _make_gridded_kernel(activation: str, eps: float):
    act = _ACTIVATIONS[activation]

    def kernel(x_ref, w_ref, aux_ref, out_ref, h_ref):
        i = pl.program_id(0)
        last = pl.num_programs(0) - 1

        @pl.when(i == 0)
        def _():
            h_ref[...] = x_ref[...]            # already in matmul dtype (host cast)

        # MXU matmul, f32 accumulation.  (in, out) layout weights.
        y = jnp.dot(h_ref[...], w_ref[0], preferred_element_type=jnp.float32)

        # Hidden layer: training-mode BatchNorm1d + activation (bias dropped).
        @pl.when(i != last)
        def _():
            gb = aux_ref[0]                    # (2, P): [gamma; beta]
            mean = jnp.mean(y, axis=0, keepdims=True)
            yc = y - mean
            var = jnp.mean(yc * yc, axis=0, keepdims=True)
            scale = gb[0:1, :] * lax.rsqrt(var + eps)
            h_ref[...] = act(yc * scale + gb[1:2, :]).astype(h_ref.dtype)

        # Final Linear: add bias (stored in aux[last, 0]) and store lane-dense.
        @pl.when(i == last)
        def _():
            out_ref[...] = (y + aux_ref[0, 0:1, :]).astype(out_ref.dtype)

    return kernel


def _mlp_forward_gridded(x, hidden_params, final_params, activation, eps, mm_dtype):
    nb_hidden = len(hidden_params)
    L = nb_hidden + 1
    B, input_size = x.shape
    output_size = final_params[0].shape[0]
    hidden_size = hidden_params[0][0].shape[0] if nb_hidden else input_size
    P = max(_round_up(d, _LANE) for d in (input_size, hidden_size, output_size))
    w_bytes = mm_dtype.itemsize

    def pad2(a):
        return jnp.pad(a, ((0, P - a.shape[0]), (0, P - a.shape[1])))

    def pad1(v):
        return jnp.pad(v.astype(jnp.float32), (0, P - v.shape[0]))

    # Pre-transposed, zero-padded weight stack, host-cast to the matmul dtype.
    w_blocks = [pad2(w.T.astype(jnp.float32)) for (w, _b, _g, _bt) in hidden_params]
    w_blocks.append(pad2(final_params[0].T.astype(jnp.float32)))
    w_stack = jnp.stack(w_blocks, axis=0).astype(mm_dtype)      # (L, P, P)

    aux_blocks = [jnp.stack([pad1(g), pad1(beta)], axis=0)
                  for (_w, _b, g, beta) in hidden_params]
    aux_blocks.append(jnp.stack([pad1(final_params[1]),
                                 jnp.zeros((P,), jnp.float32)], axis=0))
    aux = jnp.stack(aux_blocks, axis=0)                          # (L, 2, P)

    x_pad = jnp.pad(x.astype(jnp.float32),
                    ((0, 0), (0, P - input_size))).astype(mm_dtype)

    flops = 2 * B * P * P * L
    trans = nb_hidden * (P + (B * P if activation in _EUP_ACTS else 0))
    bytes_accessed = B * P * w_bytes + L * P * P * w_bytes + L * 2 * P * 4 + B * P * 4
    cost = pl.CostEstimate(flops=flops, transcendentals=trans,
                           bytes_accessed=bytes_accessed)

    # Double-buffered weight/aux blocks + resident x/out + persistent h scratch.
    vmem_need = (2 * (P * P * w_bytes + 2 * P * 4 + B * P * w_bytes + B * P * 4)
                 + B * P * w_bytes)
    vmem_lim = min(int(vmem_need * 1.25) + (2 << 20), 100 << 20)
    # TODO(synk): for v7x (64 MiB VMEM) add output-feature (N) tiling of the
    # weight block (exact for per-feature BN stats) when P is very large.

    out_pad = pl.pallas_call(
        _make_gridded_kernel(activation, eps),
        out_shape=jax.ShapeDtypeStruct((B, P), jnp.float32),
        grid_spec=pltpu.PrefetchScalarGridSpec(
            num_scalar_prefetch=0,
            grid=(L,),                                        # one step per layer
            in_specs=[
                pl.BlockSpec((B, P), lambda i: (0, 0)),           # x (resident)
                pl.BlockSpec((1, P, P), lambda i: (i, 0, 0)),     # layer i weight
                pl.BlockSpec((1, 2, P), lambda i: (i, 0, 0)),     # layer i gamma/beta|bias
            ],
            out_specs=pl.BlockSpec((B, P), lambda i: (0, 0)),     # written at last step
            scratch_shapes=[pltpu.VMEM((B, P), mm_dtype)],        # persistent activation
        ),
        compiler_params=pltpu.CompilerParams(
            dimension_semantics=("arbitrary",),                   # layers are sequential
            vmem_limit_bytes=vmem_lim,
        ),
        cost_estimate=cost,
    )(x_pad, w_stack, aux)

    return out_pad[:, :output_size]


# ----------------------------------------------------------------------------
# Public entry point.
# ----------------------------------------------------------------------------
def mlp_forward(x, hidden_params, final_params, *, activation="relu",
                eps: float = 1e-5, matmul_dtype=None,
                fused_vmem_budget_bytes: int = 32 << 20):
    """Forward pass of the Mlp module (training-mode BatchNorm).

    x:             (B, input_size) f32
    hidden_params: list of (w, b, gamma, beta); w: (out, in), rest: (out,)
    final_params:  (w_last, b_last)
    matmul_dtype:  e.g. jnp.bfloat16 on v6e/v7x (weights/activations stored and
                   DMA'd in bf16, host-side cast); None keeps full f32.
    """
    nb_hidden = len(hidden_params)
    n_layers = nb_hidden + 1
    B, input_size = x.shape
    output_size = final_params[0].shape[0]

    mm_dtype = jnp.dtype(matmul_dtype) if matmul_dtype is not None else jnp.dtype(jnp.float32)
    w_bytes = mm_dtype.itemsize

    sizes = ([input_size]
             + [w.shape[0] for (w, _b, _g, _bt) in hidden_params]
             + [output_size])
    kp = [_round_up(s, _LANE) for s in sizes]          # per-layer padded dims

    # Resident footprint of the fused (single-call) path.
    fused_bytes = (B * kp[0] * w_bytes
                   + sum(kp[i] * kp[i + 1] for i in range(n_layers)) * w_bytes
                   + sum(2 * kp[i + 1] for i in range(n_layers)) * 4
                   + B * kp[-1] * 4
                   + 4 * B * max(kp) * 4)              # live f32 temporaries
    if fused_bytes <= fused_vmem_budget_bytes:
        return _mlp_forward_fused(x, hidden_params, final_params, activation,
                                  eps, mm_dtype, kp, fused_bytes)
    return _mlp_forward_gridded(x, hidden_params, final_params, activation,
                                eps, mm_dtype)


# ----------------------------------------------------------------------------
# Init + pure-JAX reference (exact PyTorch forward, incl. hidden biases).
# ----------------------------------------------------------------------------
def init_mlp_params(key, input_size, nb_hidden_layer,
                    nb_neurons_per_hidden_layer, output_size):
    """PyTorch-style init: Linear ~ U(-1/sqrt(fan_in), +), BN gamma=1, beta=0."""
    sizes = [input_size] + [nb_neurons_per_hidden_layer] * nb_hidden_layer + [output_size]
    hidden_params = []
    for i in range(nb_hidden_layer):
        fan_in, fan_out = sizes[i], sizes[i + 1]
        key, kw, kb = jax.random.split(key, 3)
        bound = 1.0 / math.sqrt(fan_in)
        w = jax.random.uniform(kw, (fan_out, fan_in), jnp.float32, -bound, bound)
        b = jax.random.uniform(kb, (fan_out,), jnp.float32, -bound, bound)
        g = jnp.ones((fan_out,), jnp.float32)
        beta = jnp.zeros((fan_out,), jnp.float32)
        hidden_params.append((w, b, g, beta))
    fan_in, fan_out = sizes[-2], sizes[-1]
    key, kw, kb = jax.random.split(key, 3)
    bound = 1.0 / math.sqrt(fan_in)
    w_last = jax.random.uniform(kw, (fan_out, fan_in), jnp.float32, -bound, bound)
    b_last = jax.random.uniform(kb, (fan_out,), jnp.float32, -bound, bound)
    return hidden_params, (w_last, b_last)


def mlp_reference(x, hidden_params, final_params, activation="relu", eps=1e-5):
    """Pure-JAX reference of the exact PyTorch forward (includes hidden biases,
    training-mode BN) — validates that dropping the bias in the kernel is exact."""
    act = _ACTIVATIONS[activation]
    h = x
    for (w, b, g, beta) in hidden_params:
        h = h @ w.T + b
        mean = jnp.mean(h, axis=0, keepdims=True)
        var = jnp.mean((h - mean) ** 2, axis=0, keepdims=True)
        h = (h - mean) / jnp.sqrt(var + eps) * g + beta
        h = act(h)
    w, b = final_params
    return h @ w.T + b


if __name__ == "__main__":
    # Mlp(input_size=16, nb_hidden_layer=2, nb_neurons_per_hidden_layer=32,
    #     output_size=8, activation='relu'), batch=8.
    input_size = 16
    nb_hidden_layer = 2
    nb_neurons_per_hidden_layer = 32
    output_size = 8
    batch = 8

    key = jax.random.PRNGKey(0)
    key, kx = jax.random.split(key)
    x = jax.random.normal(kx, (batch, input_size), jnp.float32)

    hidden_params, final_params = init_mlp_params(
        key, input_size, nb_hidden_layer, nb_neurons_per_hidden_layer, output_size)

    ref = mlp_reference(x, hidden_params, final_params, activation="relu")

    # 1) Fused single-call path, f32 MXU (exact vs. the f32 reference).
    out = jax.block_until_ready(
        mlp_forward(x, hidden_params, final_params, activation="relu"))
    assert out.shape == (batch, output_size)
    assert jnp.allclose(out, ref, atol=1e-4, rtol=1e-4), "fused f32 mismatch"

    # 2) Fused path with host-side bf16 weights/activations (perf config on v6e/v7x).
    out_bf16 = jax.block_until_ready(
        mlp_forward(x, hidden_params, final_params, activation="relu",
                    matmul_dtype=jnp.bfloat16))
    assert out_bf16.shape == (batch, output_size)
    assert bool(jnp.all(jnp.isfinite(out_bf16)))
    assert float(jnp.max(jnp.abs(out_bf16 - ref))) < 0.25, "fused bf16 mismatch"

    # 3) Layer-gridded fallback (used when weights don't fit the VMEM budget);
    #    forced here by setting the fused budget to 0.
    out_g = jax.block_until_ready(
        mlp_forward(x, hidden_params, final_params, activation="relu",
                    fused_vmem_budget_bytes=0))
    assert out_g.shape == (batch, output_size)
    assert jnp.allclose(out_g, ref, atol=1e-4, rtol=1e-4), "gridded mismatch"

    print("KERNEL_OK")
</pallas_src>

<mosaic_0001>
module attributes {stable_mosaic.version = 11 : i64} {
  func.func @kernel(%arg0: memref<8x128xf32, #tpu.memory_space<vmem>>, %arg1: memref<128x128xf32, #tpu.memory_space<vmem>>, %arg2: memref<128x128xf32, #tpu.memory_space<vmem>>, %arg3: memref<128x128xf32, #tpu.memory_space<vmem>>, %arg4: memref<2x128xf32, #tpu.memory_space<vmem>>, %arg5: memref<2x128xf32, #tpu.memory_space<vmem>>, %arg6: memref<2x128xf32, #tpu.memory_space<vmem>>, %arg7: memref<8x128xf32, #tpu.memory_space<vmem>>) attributes {dimension_semantics = [], scalar_prefetch = 0 : i64, scratch_operands = 0 : i64, tpu.core_type = #tpu.core_type<tc>} {
    %c0 = arith.constant 0 : index
    %c0_0 = arith.constant 0 : index
    %0 = vector.load %arg0[%c0, %c0_0] : memref<8x128xf32, #tpu.memory_space<vmem>>, vector<8x128xf32>
    %c0_1 = arith.constant 0 : index
    %c0_2 = arith.constant 0 : index
    %1 = vector.load %arg1[%c0_1, %c0_2] : memref<128x128xf32, #tpu.memory_space<vmem>>, vector<128x128xf32>
    %cst = arith.constant dense<0.000000e+00> : vector<8x128xf32>
    %2 = tpu.matmul %0, %1, %cst {dimension_numbers = #tpu.dot_dimension_numbers<[1], [0], [0], [1], [0, 0, 1, 1], [], []>} : vector<8x128xf32>, vector<128x128xf32>, vector<8x128xf32> -> vector<8x128xf32>
    %c0_3 = arith.constant 0 : index
    %c0_4 = arith.constant 0 : index
    %3 = vector.load %arg4[%c0_3, %c0_4] : memref<2x128xf32, #tpu.memory_space<vmem>>, vector<2x128xf32>
    %cst_5 = arith.constant dense<0.000000e+00> : vector<128xf32>
    %4 = vector.multi_reduction <add>, %2, %cst_5 [0] : vector<8x128xf32> to vector<128xf32>
    %5 = vector.shape_cast %4 : vector<128xf32> to vector<1x128xf32>
    %cst_6 = arith.constant 8.000000e+00 : f32
    %6 = vector.broadcast %cst_6 : f32 to vector<1x128xf32>
    %7 = arith.divf %5, %6 : vector<1x128xf32>
    %8 = vector.broadcast %7 : vector<1x128xf32> to vector<8x128xf32>
    %9 = arith.subf %2, %8 : vector<8x128xf32>
    %10 = arith.mulf %9, %9 : vector<8x128xf32>
    %cst_7 = arith.constant dense<0.000000e+00> : vector<128xf32>
    %11 = vector.multi_reduction <add>, %10, %cst_7 [0] : vector<8x128xf32> to vector<128xf32>
    %12 = vector.shape_cast %11 : vector<128xf32> to vector<1x128xf32>
    %cst_8 = arith.constant 8.000000e+00 : f32
    %13 = vector.broadcast %cst_8 : f32 to vector<1x128xf32>
    %14 = arith.divf %12, %13 : vector<1x128xf32>
    %15 = vector.extract_strided_slice %3 {offsets = [0, 0], sizes = [1, 128], strides = [1, 1]} : vector<2x128xf32> to vector<1x128xf32>
    %cst_9 = arith.constant 9.99999974E-6 : f32
    %16 = vector.broadcast %cst_9 : f32 to vector<1x128xf32>
    %17 = arith.addf %14, %16 : vector<1x128xf32>
    %18 = math.rsqrt %17 : vector<1x128xf32>
    %19 = arith.mulf %15, %18 : vector<1x128xf32>
    %20 = vector.broadcast %19 : vector<1x128xf32> to vector<8x128xf32>
    %21 = arith.mulf %9, %20 : vector<8x128xf32>
    %22 = vector.extract_strided_slice %3 {offsets = [1, 0], sizes = [1, 128], strides = [1, 1]} : vector<2x128xf32> to vector<1x128xf32>
    %23 = vector.broadcast %22 : vector<1x128xf32> to vector<8x128xf32>
    %24 = arith.addf %21, %23 : vector<8x128xf32>
    %cst_10 = arith.constant 0.000000e+00 : f32
    %25 = vector.broadcast %cst_10 : f32 to vector<8x128xf32>
    %26 = arith.maximumf %24, %25 : vector<8x128xf32>
    %c0_11 = arith.constant 0 : index
    %c0_12 = arith.constant 0 : index
    %27 = vector.load %arg2[%c0_11, %c0_12] : memref<128x128xf32, #tpu.memory_space<vmem>>, vector<128x128xf32>
    %cst_13 = arith.constant dense<0.000000e+00> : vector<8x128xf32>
    %28 = tpu.matmul %26, %27, %cst_13 {dimension_numbers = #tpu.dot_dimension_numbers<[1], [0], [0], [1], [0, 0, 1, 1], [], []>} : vector<8x128xf32>, vector<128x128xf32>, vector<8x128xf32> -> vector<8x128xf32>
    %c0_14 = arith.constant 0 : index
    %c0_15 = arith.constant 0 : index
    %29 = vector.load %arg5[%c0_14, %c0_15] : memref<2x128xf32, #tpu.memory_space<vmem>>, vector<2x128xf32>
    %cst_16 = arith.constant dense<0.000000e+00> : vector<128xf32>
    %30 = vector.multi_reduction <add>, %28, %cst_16 [0] : vector<8x128xf32> to vector<128xf32>
    %31 = vector.shape_cast %30 : vector<128xf32> to vector<1x128xf32>
    %cst_17 = arith.constant 8.000000e+00 : f32
    %32 = vector.broadcast %cst_17 : f32 to vector<1x128xf32>
    %33 = arith.divf %31, %32 : vector<1x128xf32>
    %34 = vector.broadcast %33 : vector<1x128xf32> to vector<8x128xf32>
    %35 = arith.subf %28, %34 : vector<8x128xf32>
    %36 = arith.mulf %35, %35 : vector<8x128xf32>
    %cst_18 = arith.constant dense<0.000000e+00> : vector<128xf32>
    %37 = vector.multi_reduction <add>, %36, %cst_18 [0] : vector<8x128xf32> to vector<128xf32>
    %38 = vector.shape_cast %37 : vector<128xf32> to vector<1x128xf32>
    %cst_19 = arith.constant 8.000000e+00 : f32
    %39 = vector.broadcast %cst_19 : f32 to vector<1x128xf32>
    %40 = arith.divf %38, %39 : vector<1x128xf32>
    %41 = vector.extract_strided_slice %29 {offsets = [0, 0], sizes = [1, 128], strides = [1, 1]} : vector<2x128xf32> to vector<1x128xf32>
    %cst_20 = arith.constant 9.99999974E-6 : f32
    %42 = vector.broadcast %cst_20 : f32 to vector<1x128xf32>
    %43 = arith.addf %40, %42 : vector<1x128xf32>
    %44 = math.rsqrt %43 : vector<1x128xf32>
    %45 = arith.mulf %41, %44 : vector<1x128xf32>
    %46 = vector.broadcast %45 : vector<1x128xf32> to vector<8x128xf32>
    %47 = arith.mulf %35, %46 : vector<8x128xf32>
    %48 = vector.extract_strided_slice %29 {offsets = [1, 0], sizes = [1, 128], strides = [1, 1]} : vector<2x128xf32> to vector<1x128xf32>
    %49 = vector.broadcast %48 : vector<1x128xf32> to vector<8x128xf32>
    %50 = arith.addf %47, %49 : vector<8x128xf32>
    %cst_21 = arith.constant 0.000000e+00 : f32
    %51 = vector.broadcast %cst_21 : f32 to vector<8x128xf32>
    %52 = arith.maximumf %50, %51 : vector<8x128xf32>
    %c0_22 = arith.constant 0 : index
    %c0_23 = arith.constant 0 : index
    %53 = vector.load %arg3[%c0_22, %c0_23] : memref<128x128xf32, #tpu.memory_space<vmem>>, vector<128x128xf32>
    %cst_24 = arith.constant dense<0.000000e+00> : vector<8x128xf32>
    %54 = tpu.matmul %52, %53, %cst_24 {dimension_numbers = #tpu.dot_dimension_numbers<[1], [0], [0], [1], [0, 0, 1, 1], [], []>} : vector<8x128xf32>, vector<128x128xf32>, vector<8x128xf32> -> vector<8x128xf32>
    %c0_25 = arith.constant 0 : index
    %c0_26 = arith.constant 0 : index
    %55 = vector.load %arg6[%c0_25, %c0_26] : memref<2x128xf32, #tpu.memory_space<vmem>>, vector<1x128xf32>
    %56 = vector.broadcast %55 : vector<1x128xf32> to vector<8x128xf32>
    %57 = arith.addf %54, %56 : vector<8x128xf32>
    %c0_27 = arith.constant 0 : index
    %c0_28 = arith.constant 0 : index
    %58 = vector.load %arg7[%c0_27, %c0_28] : memref<8x128xf32, #tpu.memory_space<vmem>>, vector<8x128xf32>
    tpu.vector_store %arg7[%c0_27, %c0_28], %57 {strides = array<i32>} : memref<8x128xf32, #tpu.memory_space<vmem>>, vector<8x128xf32>,
    return
  }
}

</mosaic_0001>

<bundles_post_ra>
// kernel: tpu_custom_call.1
= control target key start
LH: loop header
LB: loop body
LE: loop exit
PB: predicated region body
PF: predicated region fallthrough
CT: control target
= control target key end

     0   :  { %12 = vsyncpa [#allocation3], 0  ;;  %s953_s0 = inlined_call_operand.hbm [shape: f32[8,128], index: 0, kind: input, shape index: {}]   ;;  %s954_s1 = inlined_call_operand.hbm [shape: f32[128,128], index: 1, kind: input, shape index: {}]   ;;  %s955_s2 = inlined_call_operand.hbm [shape: f32[128,128], index: 2, kind: input, shape index: {}]   ;;  %s956_s3 = inlined_call_operand.hbm [shape: f32[128,128], index: 3, kind: input, shape index: {}]   ;;  %s957_s4 = inlined_call_operand.vmem [shape: f32[2,128], index: 4, kind: input, shape index: {}]   ;;  %s958_s5 = inlined_call_operand.vmem [shape: f32[2,128], index: 5, kind: input, shape index: {}]   ;;  %s959_s6 = inlined_call_operand.vmem [shape: f32[2,128], index: 6, kind: input, shape index: {}]   ;;  %s960_s7 = inlined_call_operand.hbm [shape: f32[8,128], index: 7, kind: output, shape index: {}]  }
   0x1   :  { %13 = vsyncpa [#allocation6], 0 }
   0x2   :  { %14 = vsyncpa [#allocation9], 0 }
   0x3   :  { %15 = vsyncpa [#allocation4], 0  ;;  %s786_s24 = smov [#allocation5]   ;;  %s668_s28 = scalar_lea.hbm %s954_s1, 2048 }
   0x4   :  { %s31_s25 = sshll.u32 %s786_s24, 4  ;;  %p669_p0 = scmp.ne.s32.totalorder %s954_s1, %s668_s28  ;;  %s32_s25 = int_to_ptr.vmem [resolvable:$true] %s31_s25 }
   0x5   :  { %p672_p1 = scmp.lt.u32.totalorder %s668_s28, %s954_s1 }
   0x7   :  { %p674_p2 = pnand %p672_p1, %p669_p0 }
   0x9   :  { %677 = shalt.err (!%p674_p2)
}
   0xa   :  { %s678_s10 = scalar_lea.vmem %s32_s25, 2048  ;;  %p683_p4 = scmp.lt.s32.totalorder %s32_s25, %s32_s25 }
   0xb   :  { %p679_p3 = scmp.ne.s32.totalorder %s32_s25, %s678_s10  ;;  %p684_p5 = scmp.lt.s32.totalorder %s678_s10, %s678_s10 }
   0xd   :  { %p685_p6 = por %p684_p5, %p683_p4 }
   0xf   :  { %p686_p7 = pnand %p685_p6, %p679_p3 }
  0x11   :  { %689 = shalt.err (!%p686_p7)
}
  0x12   :  { %s787_s11 = smov 128   ;;  %s788_s12 = smov 8  }
  0x13   :  { %37 = dma.hbm_to_vmem [thread:$0]  %s954_s1, 2048, %s32_s25, [#allocation6], %s787_s11, %s787_s11, %s788_s12  }
  0x14   :  { %s789_s15 = smov [#allocation2]   ;;  %s790_s17 = smov [#allocation7]  }
  0x15   :  { %s22_s16 = sshll.u32 %s789_s15, 4  ;;  %s43_s18 = sshll.u32 %s790_s17, 4  ;;  %s23_s16 = int_to_ptr.vmem [resolvable:$true] %s22_s16  ;;  %s44_s18 = int_to_ptr.vmem [resolvable:$true] %s43_s18 }
  0x16   :  { %s690_s21 = scalar_lea.hbm %s953_s0, 128 }
  0x17   :  { %p691_p8 = scmp.ne.s32.totalorder %s953_s0, %s690_s21  ;;  %p694_p9 = scmp.lt.u32.totalorder %s690_s21, %s953_s0 }
  0x19   :  { %p696_p10 = pnand %p694_p9, %p691_p8 }
  0x1b   :  { %699 = shalt.err (!%p696_p10)
}
  0x1c   :  { %s700_s1 = scalar_lea.vmem %s23_s16, 128  ;;  %p705_p12 = scmp.lt.s32.totalorder %s23_s16, %s23_s16 }
  0x1d   :  { %p701_p11 = scmp.ne.s32.totalorder %s23_s16, %s700_s1  ;;  %p706_p13 = scmp.lt.s32.totalorder %s700_s1, %s700_s1 }
  0x1f   :  { %p707_p0 = por %p706_p13, %p705_p12 }
  0x21   :  { %p708_p1 = pnand %p707_p0, %p701_p11 }
  0x23   :  { %711 = shalt.err (!%p708_p1)
}
  0x24   :  { %25 = dma.hbm_to_vmem [thread:$0]  %s953_s0, 128, %s23_s16, [#allocation3]  }
  0x25   :  { %s712_s30 = scalar_lea.hbm %s955_s2, 2048 }
  0x26   :  { %p713_p2 = scmp.ne.s32.totalorder %s955_s2, %s712_s30  ;;  %p716_p3 = scmp.lt.u32.totalorder %s712_s30, %s955_s2 }
  0x28   :  { %p718_p4 = pnand %p716_p3, %p713_p2 }
  0x2a   :  { %721 = shalt.err (!%p718_p4)
}
  0x2b   :  { %s722_s14 = scalar_lea.vmem %s44_s18, 2048  ;;  %p727_p6 = scmp.lt.s32.totalorder %s44_s18, %s44_s18 }
  0x2c   :  { %p723_p5 = scmp.ne.s32.totalorder %s44_s18, %s722_s14  ;;  %p728_p7 = scmp.lt.s32.totalorder %s722_s14, %s722_s14 }
  0x2e   :  { %p729_p8 = por %p728_p7, %p727_p6 }
  0x30   :  { %p730_p9 = pnand %p729_p8, %p723_p5 }
  0x32   :  { %733 = shalt.err (!%p730_p9)
}
  0x33   :  { %49 = dma.hbm_to_vmem [thread:$0]  %s955_s2, 2048, %s44_s18, [#allocation6], %s787_s11, %s787_s11, %s788_s12  }
  0x34   :  { %s791_s16 = smov [#allocation8]   ;;  %s734_s21 = scalar_lea.hbm %s956_s3, 2048 }
  0x35   :  { %s55_s17 = sshll.u32 %s791_s16, 4  ;;  %p735_p10 = scmp.ne.s32.totalorder %s956_s3, %s734_s21  ;;  %s56_s17 = int_to_ptr.vmem [resolvable:$true] %s55_s17 }
  0x36   :  { %p738_p11 = scmp.lt.u32.totalorder %s734_s21, %s956_s3 }
  0x38   :  { %p740_p12 = pnand %p738_p11, %p735_p10 }
  0x3a   :  { %743 = shalt.err (!%p740_p12)
}
  0x3b   :  { %s744_s1 = scalar_lea.vmem %s56_s17, 2048  ;;  %p749_p0 = scmp.lt.s32.totalorder %s56_s17, %s56_s17 }
  0x3c   :  { %p745_p13 = scmp.ne.s32.totalorder %s56_s17, %s744_s1  ;;  %p750_p1 = scmp.lt.s32.totalorder %s744_s1, %s744_s1 }
  0x3e   :  { %p751_p2 = por %p750_p1, %p749_p0 }
  0x40   :  { %p752_p3 = pnand %p751_p2, %p745_p13 }
  0x42   :  { %755 = shalt.err (!%p752_p3)
}
  0x43   :  { %61 = dma.hbm_to_vmem [thread:$0]  %s956_s3, 2048, %s56_s17, [#allocation9], %s787_s11, %s787_s11, %s788_s12  }
  0x44   :  { %778 = dma.done.wait [#allocation3], 128  }
  0x45   :  { %779 = vsyncadd [#allocation3], 4294967168 }
  0x46   :  { %780 = dma.done.wait [#allocation6], 4096  }
  0x47   :  { %781 = vsyncadd [#allocation6], 4294963200 }
  0x48   :  { %782 = dma.done.wait [#allocation9], 2048  }
  0x49   :  { %783 = vsyncadd [#allocation9], 4294965248  ;;  %v792_v0 = vmov 0.0|0.0   ;;  %vm793_vm0 = vmmov 0   ;;  %v794_v1 = vmov 0.0   ;;  %v81_v2 = vld [vmem:[#allocation5] sm:$0xff] }
  0x4a   :  { %582 = vmatprep.subr.bf16.mxu0 %v792_v0  ;;  %509 = vmatprep.mubr.msk.f32.mxu0 %vm793_vm0, %v794_v1  ;;  %v82_v3 = vld [vmem:[#allocation5 + $0x8] sm:$0xff]  ;;  %v83_v4 = vld [vmem:[#allocation5 + $0x10] sm:$0xff]  ;;  %v84_v6 = vld [vmem:[#allocation5 + $0x18] sm:$0xff]  ;;  %s795_s28 = smov [#allocation10]  }
  0x4b   :  { %606 = vmatprep.subr.bf16.mxu1 %v792_v0  ;;  %544 = vmatprep.mubr.msk.f32.mxu1 %vm793_vm0, %v794_v1  ;;  %v583_v5 = vpack.c.bf16 %v82_v3, %v81_v2  ;;  %v586_v7 = vpack.c.bf16 %v84_v6, %v83_v4  ;;  %v85_v8 = vld [vmem:[#allocation5 + $0x20] sm:$0xff]  ;;  %v86_v9 = vld [vmem:[#allocation5 + $0x28] sm:$0xff]  ;;  %v87_v11 = vld [vmem:[#allocation5 + $0x30] sm:$0xff]  ;;  %s414_s29 = sshll.u32 %s795_s28, 4  ;;  %s415_s29 = int_to_ptr.vmem [resolvable:$true] %s414_s29 }
  0x4c   :  { %v589_v10 = vpack.c.bf16 %v86_v9, %v85_v8  ;;  %v88_v12 = vld [vmem:[#allocation5 + $0x38] sm:$0xff]  ;;  %v89_v14 = vld [vmem:[#allocation5 + $0x40] sm:$0xff]  ;;  %v90_v15 = vld [vmem:[#allocation5 + $0x48] sm:$0xff]  ;;  %p761_p5 = scmp.lt.s32.totalorder %s415_s29, %s415_s29 }
  0x4d   :  { %584 = vmatpush3.bf16.msra.mxu0 %v583_v5  ;;  %v592_v13 = vpack.c.bf16 %v88_v12, %v87_v11  ;;  %v595_v16 = vpack.c.bf16 %v90_v15, %v89_v14  ;;  %v91_v17 = vld [vmem:[#allocation5 + $0x50] sm:$0xff]  ;;  %v92_v18 = vld [vmem:[#allocation5 + $0x58] sm:$0xff]  ;;  %v93_v20 = vld [vmem:[#allocation5 + $0x60] sm:$0xff] }
  0x4e   :  { %585 = vmatprep.subr.bf16.mxu0 %v792_v0  ;;  %v598_v19 = vpack.c.bf16 %v92_v18, %v91_v17  ;;  %v94_v21 = vld [vmem:[#allocation5 + $0x68] sm:$0xff]  ;;  %v95_v23 = vld [vmem:[#allocation5 + $0x70] sm:$0xff]  ;;  %v96_v24 = vld [vmem:[#allocation5 + $0x78] sm:$0xff] }
  0x4f   :  { %v601_v22 = vpack.c.bf16 %v94_v21, %v93_v20  ;;  %v604_v25 = vpack.c.bf16 %v96_v24, %v95_v23  ;;  %v80_v26 = vld [vmem:[#allocation2] sm:$0xff]  ;;  %v199_v27 = vld [vmem:[#allocation7] sm:$0xff]  ;;  %v200_v28 = vld [vmem:[#allocation7 + $0x8] sm:$0xff] }
  0x50   :  { %v607_v29 = vpack.c.bf16 %v200_v28, %v199_v27  ;;  %v201_v30 = vld [vmem:[#allocation7 + $0x10] sm:$0xff]  ;;  %v202_v31 = vld [vmem:[#allocation7 + $0x18] sm:$0xff]  ;;  %v203_v33 = vld [vmem:[#allocation7 + $0x20] sm:$0xff] }
  0x51   :  { %587 = vmatpush3.bf16.msra.mxu0 %v586_v7  ;;  %v610_v32 = vpack.c.bf16 %v202_v31, %v201_v30  ;;  %v204_v34 = vld [vmem:[#allocation7 + $0x28] sm:$0xff]  ;;  %v205_v36 = vld [vmem:[#allocation7 + $0x30] sm:$0xff]  ;;  %v206_v37 = vld [vmem:[#allocation7 + $0x38] sm:$0xff]  ;;  %v188_v7 = vlaneseq }
  0x52   :  { %588 = vmatprep.subr.bf16.mxu0 %v792_v0  ;;  %608 = vmatpush3.bf16.msra.mxu1 %v607_v29  ;;  %v613_v35 = vpack.c.bf16 %v204_v34, %v203_v33  ;;  %v616_v38 = vpack.c.bf16 %v206_v37, %v205_v36  ;;  %v207_v39 = vld [vmem:[#allocation7 + $0x40] sm:$0xff]  ;;  %v208_v40 = vld [vmem:[#allocation7 + $0x48] sm:$0xff]  ;;  %v209_v42 = vld [vmem:[#allocation7 + $0x50] sm:$0xff] }
  0x53   :  { %609 = vmatprep.subr.bf16.mxu1 %v792_v0  ;;  %v619_v41 = vpack.c.bf16 %v208_v40, %v207_v39  ;;  %v210_v43 = vld [vmem:[#allocation7 + $0x58] sm:$0xff]  ;;  %v211_v45 = vld [vmem:[#allocation7 + $0x60] sm:$0xff]  ;;  %v212_v46 = vld [vmem:[#allocation7 + $0x68] sm:$0xff]  ;;  %v913_v8 = vshrl.u32 %v188_v7, 7 }
  0x54   :  { %v622_v44 = vpack.c.bf16 %v210_v43, %v209_v42  ;;  %v625_v47 = vpack.c.bf16 %v212_v46, %v211_v45  ;;  %v213_v48 = vld [vmem:[#allocation7 + $0x70] sm:$0xff]  ;;  %v214_v49 = vld [vmem:[#allocation7 + $0x78] sm:$0xff]  ;;  %v317_v20 = vld [vmem:[#allocation8 + $0x8] sm:$0xff] }
  0x55   :  { %590 = vmatpush3.bf16.msra.mxu0 %v589_v10  ;;  %v628_v50 = vpack.c.bf16 %v214_v49, %v213_v48  ;;  %v167_v9 = vld [vmem:[%s957_s4] sm:$0x3]  ;;  %v190_v10 = vsub.s32 0, %v913_v8  ;;  %v195_v11 = vsub.s32 1, %v913_v8  ;;  %v322_v28 = vld [vmem:[#allocation8 + $0x30] sm:$0xff]  ;;  %v324_v31 = vld [vmem:[#allocation8 + $0x40] sm:$0xff] }
  0x56   :  { %591 = vmatprep.subr.bf16.mxu0 %v792_v0  ;;  %611 = vmatpush3.bf16.msra.mxu1 %v610_v32  ;;  %v319_v23 = vld [vmem:[#allocation8 + $0x18] sm:$0xff]  ;;  %v325_v32 = vld [vmem:[#allocation8 + $0x48] sm:$0xff]  ;;  %v326_v34 = vld [vmem:[#allocation8 + $0x50] sm:$0xff] }
  0x57   :  { %612 = vmatprep.subr.bf16.mxu1 %v792_v0  ;;  %v196_v15 = vrot.slane %v167_v9, %v195_v11  ;;  %v323_v29 = vld [vmem:[#allocation8 + $0x38] sm:$0xff]  ;;  %v643_v33 = vpack.c.bf16 %v325_v32, %v324_v31  ;;  %v328_v37 = vld [vmem:[#allocation8 + $0x60] sm:$0xff]  ;;  %v330_v40 = vld [vmem:[#allocation8 + $0x70] sm:$0xff] }
  0x58   :  { %v640_v30 = vpack.c.bf16 %v323_v29, %v322_v28 }
  0x59   :  { %593 = vmatpush3.bf16.msra.mxu0 %v592_v13 }
  0x5a   :  { %594 = vmatprep.subr.bf16.mxu0 %v792_v0  ;;  %614 = vmatpush3.bf16.msra.mxu1 %v613_v35  ;;  %v327_v35 = vld [vmem:[#allocation8 + $0x58] sm:$0xff] }
  0x5b   :  { %615 = vmatprep.subr.bf16.mxu1 %v792_v0  ;;  %v646_v36 = vpack.c.bf16 %v327_v35, %v326_v34 }
  0x5d   :  { %596 = vmatpush3.bf16.msra.mxu0 %v595_v16 }
  0x5e   :  { %597 = vmatprep.subr.bf16.mxu0 %v792_v0  ;;  %617 = vmatpush3.bf16.msra.mxu1 %v616_v38  ;;  %v329_v38 = vld [vmem:[#allocation8 + $0x68] sm:$0xff] }
  0x5f   :  { %618 = vmatprep.subr.bf16.mxu1 %v792_v0  ;;  %v649_v39 = vpack.c.bf16 %v329_v38, %v328_v37 }
  0x61   :  { %599 = vmatpush3.bf16.msra.mxu0 %v598_v19  ;;  %v316_v19 = vld [vmem:[#allocation8] sm:$0xff] }
  0x62   :  { %600 = vmatprep.subr.bf16.mxu0 %v792_v0  ;;  %620 = vmatpush3.bf16.msra.mxu1 %v619_v41  ;;  %v631_v21 = vpack.c.bf16 %v317_v20, %v316_v19  ;;  %v331_v41 = vld [vmem:[#allocation8 + $0x78] sm:$0xff] }
  0x63   :  { %621 = vmatprep.subr.bf16.mxu1 %v792_v0  ;;  %v652_v42 = vpack.c.bf16 %v331_v41, %v330_v40 }
  0x65   :  { %602 = vmatpush3.bf16.msra.mxu0 %v601_v22  ;;  %v318_v22 = vld [vmem:[#allocation8 + $0x10] sm:$0xff] }
  0x66   :  { %603 = vmatprep.subr.bf16.mxu0 %v792_v0  ;;  %623 = vmatpush3.bf16.msra.mxu1 %v622_v44  ;;  %v634_v24 = vpack.c.bf16 %v319_v23, %v318_v22 }
  0x67   :  { %624 = vmatprep.subr.bf16.mxu1 %v792_v0 }
  0x69   :  { %605 = vmatpush3.bf16.msra.mxu0 %v604_v25  ;;  %v320_v25 = vld [vmem:[#allocation8 + $0x20] sm:$0xff] }
  0x6a   :  { %630 = vmatprep.subr.bf16.mxu0 %v792_v0  ;;  %626 = vmatpush3.bf16.msra.mxu1 %v625_v47 }
  0x6b   :  { %627 = vmatprep.subr.bf16.mxu1 %v792_v0 }
  0x6c   :  { %510 = vmatmul.mubr.f32.vlgmr.msra.gmra.mrb[0].mxu0 %v80_v26  ;;  %v321_v26 = vld [vmem:[#allocation8 + $0x28] sm:$0xff] }
  0x6d   :  { %579 = vmatprep.mubr.msk.f32.mxu0 %vm793_vm0, %v794_v1  ;;  %632 = vmatpush3.bf16.msra.mxu0 %v631_v21  ;;  %v637_v27 = vpack.c.bf16 %v321_v26, %v320_v25 }
  0x6e   :  { %629 = vmatpush3.bf16.msra.mxu1 %v628_v50  ;;  %633 = vmatprep.subr.bf16.mxu0 %v792_v0 }
  0x71   :  { %635 = vmatpush3.bf16.msra.mxu0 %v634_v24 }
  0x72   :  { %636 = vmatprep.subr.bf16.mxu0 %v792_v0 }
  0x75   :  { %638 = vmatpush3.bf16.msra.mxu0 %v637_v27 }
  0x76   :  { %639 = vmatprep.subr.bf16.mxu0 %v792_v0 }
  0x79   :  { %641 = vmatpush3.bf16.msra.mxu0 %v640_v30 }
  0x7a   :  { %642 = vmatprep.subr.bf16.mxu0 %v792_v0 }
  0x7d   :  { %644 = vmatpush3.bf16.msra.mxu0 %v643_v33 }
  0x7e   :  { %645 = vmatprep.subr.bf16.mxu0 %v792_v0 }
  0x81   :  { %647 = vmatpush3.bf16.msra.mxu0 %v646_v36 }
  0x82   :  { %648 = vmatprep.subr.bf16.mxu0 %v792_v0 }
  0x85   :  { %650 = vmatpush3.bf16.msra.mxu0 %v649_v39 }
  0x86   :  { %651 = vmatprep.subr.bf16.mxu0 %v792_v0 }
  0x89   :  { %653 = vmatpush3.bf16.msra.mxu0 %v652_v42 }
 0x13f   :  { %v163_v51 = vpop.f32.mrb[0].mxu0 }
 0x140   :  { %v168_v52 = vrot.slane %v163_v51, 4  ;;  %v511_v53 = vpop.f32.mrb[1].mxu0 }
 0x142   :  { %v169_v54 = vadd.f32 %v168_v52, %v163_v51 }
 0x144   :  { %v170_v55 = vrot.slane %v169_v54, 2 }
 0x146   :  { %v171_v56 = vadd.f32 %v170_v55, %v169_v54 }
 0x148   :  { %v172_v57 = vrot.slane %v171_v56, 1 }
 0x14a   :  { %v173_v58 = vadd.f32 %v172_v57, %v171_v56 }
 0x14c   :  { %v175_v59 = vmul.f32 0.125, %v173_v58 }
 0x14e   :  { %v176_v60 = vsub.f32 %v163_v51, %v175_v59 }
 0x150   :  { %v177_v61 = vmul.f32 %v176_v60, %v176_v60 }
 0x152   :  { %v178_v62 = vrot.slane %v177_v61, 4 }
 0x154   :  { %v179_v63 = vadd.f32 %v178_v62, %v177_v61  ;;  %v285_v61 = vld [vmem:[%s958_s5] sm:$0x3]  ;;  %s756_s5 = scalar_lea.vmem %s415_s29, 128 }
 0x155   :  { %p757_p4 = scmp.ne.s32.totalorder %s415_s29, %s756_s5  ;;  %p762_p6 = scmp.lt.s32.totalorder %s756_s5, %s756_s5 }
 0x156   :  { %v180_v1 = vrot.slane %v179_v63, 2 }
 0x157   :  { %p763_p7 = por %p762_p6, %p761_p5 }
 0x158   :  { %v181_v2 = vadd.f32 %v180_v1, %v179_v63 }
 0x159   :  { %p764_p8 = pnand %p763_p7, %p757_p4 }
 0x15a   :  { %v182_v3 = vrot.slane %v181_v2, 1 }
 0x15c   :  { %v183_v4 = vadd.f32 %v182_v3, %v181_v2  ;;  %v313_v2 = vrot.slane %v285_v61, %v195_v11 }
 0x15e   :  { %v184_v5 = vmul.f32 0.125, %v183_v4 }
 0x160   :  { %v185_v6 = vadd.f32 1e-05, %v184_v5 }
 0x162   :  { %664 = vrsqrt.f32 %v185_v6  ;;  %v425_v6 = vld [vmem:[%s959_s6] ss:$0 sm:$0xff] }
 0x16c   :  { %v665_v12 = vpop.eup %664 }
 0x16d   :  { %v187_v13 = vmul.f32 %v665_v12, %v167_v9 }
 0x16f   :  { %v191_v14 = vrot.slane %v187_v13, %v190_v10 }
 0x171   :  { %v192_v16 = vmul.f32 %v191_v14, %v176_v60 }
 0x173   :  { %v197_v17 = vadd.f32 %v196_v15, %v192_v16 }
 0x175   :  { %v198_v18 = vmax.f32 %v197_v17, 0.0 }
 0x177   :  { %545 = vmatmul.mubr.f32.vlgmr.msra.gmra.mrb[0].mxu1 %v198_v18 }
 0x24a   :  { %v281_v43 = vpop.f32.mrb[0].mxu1 }
 0x24b   :  { %v286_v44 = vrot.slane %v281_v43, 4  ;;  %v546_v45 = vpop.f32.mrb[1].mxu1 }
 0x24d   :  { %v287_v46 = vadd.f32 %v286_v44, %v281_v43 }
 0x24f   :  { %v288_v47 = vrot.slane %v287_v46, 2 }
 0x251   :  { %v289_v48 = vadd.f32 %v288_v47, %v287_v46 }
 0x253   :  { %v290_v49 = vrot.slane %v289_v48, 1 }
 0x255   :  { %v291_v50 = vadd.f32 %v290_v49, %v289_v48 }
 0x257   :  { %v292_v51 = vmul.f32 0.125, %v291_v50 }
 0x259   :  { %v293_v52 = vsub.f32 %v281_v43, %v292_v51 }
 0x25b   :  { %v294_v53 = vmul.f32 %v293_v52, %v293_v52 }
 0x25d   :  { %v295_v54 = vrot.slane %v294_v53, 4 }
 0x25f   :  { %v296_v55 = vadd.f32 %v295_v54, %v294_v53 }
 0x261   :  { %v297_v56 = vrot.slane %v296_v55, 2 }
 0x263   :  { %v298_v57 = vadd.f32 %v297_v56, %v296_v55 }
 0x265   :  { %v299_v0 = vrot.slane %v298_v57, 1 }
 0x267   :  { %v300_v58 = vadd.f32 %v299_v0, %v298_v57 }
 0x269   :  { %v301_v59 = vmul.f32 0.125, %v300_v58 }
 0x26b   :  { %v302_v60 = vadd.f32 1e-05, %v301_v59 }
 0x26d   :  { %666 = vrsqrt.f32 %v302_v60 }
 0x277   :  { %v667_v62 = vpop.eup %666 }
 0x278   :  { %v304_v63 = vmul.f32 %v667_v62, %v285_v61 }
 0x27a   :  { %v308_v1 = vrot.slane %v304_v63, %v190_v10 }
 0x27c   :  { %v309_v3 = vmul.f32 %v308_v1, %v293_v52 }
 0x27e   :  { %v314_v4 = vadd.f32 %v313_v2, %v309_v3 }
 0x280   :  { %v315_v5 = vmax.f32 %v314_v4, 0.0 }
 0x282   :  { %580 = vmatmul.mubr.f32.vlgmr.msra.gmra.mrb[2].mxu0 %v315_v5 }
 0x355   :  { %v403_v7 = vpop.f32.mrb[2].mxu0 }
 0x356   :  { %v404_v9 = vadd.f32 %v425_v6, %v403_v7  ;;  %v581_v12 = vpop.f32.mrb[3].mxu0 }
 0x358   :  { %407 = vst [vmem:[#allocation10] sm:$0xff] %v404_v9 }
 0x359   :  { %767 = shalt.err (!%p764_p8)
}
 0x35a   :  { %s768_s9 = scalar_lea.hbm %s960_s7, 128 }
 0x35b   :  { %p769_p9 = scmp.ne.s32.totalorder %s960_s7, %s768_s9  ;;  %p772_p10 = scmp.lt.u32.totalorder %s768_s9, %s960_s7 }
 0x35d   :  { %p774_p11 = pnand %p772_p10, %p769_p9 }
 0x35f   :  { %777 = shalt.err (!%p774_p11)
}
 0x360   :  { %417 = dma.vmem_to_hbm [thread:$0]  %s415_s29, 128, %s960_s7, [#allocation4]  }
 0x361   :  { %784 = dma.done.wait [#allocation4], 128  }
 0x362   :  { %785 = vsyncadd [#allocation4], 4294967168 }
 0x363   :  { %421 = vsyncpa [#allocation3], 1 }
 0x364   :  { %422 = vsyncpa [#allocation6], 1 }
 0x365   :  { %423 = vsyncpa [#allocation9], 1 }
 0x366   :  { %424 = vsyncpa [#allocation4], 1 }

</bundles_post_ra>
